<compile_context>
chip_gen: v5e
topology: v5e:2x2
jax: 0.10.0
libtpu: 0.0.40
codegen_flags: <defaults>
</compile_context>

<pallas_src>
import numpy as np
import jax
import jax.numpy as jnp
from jax import lax
from jax.experimental import pallas as pl
from jax.experimental.pallas import tpu as pltpu

_EPS = float(np.finfo(np.float32).eps)

LANES = 128
SUBLANES = 8
# 8 rows x 262144 cols x 4 B = 8 MiB of payload per dense tile.
MAX_TILE_COLS = 2048 * LANES
_VMEM_LIMIT = 48 * 1024 * 1024


def _row_factor(n):
    for r in (SUBLANES, 4, 2, 1):
        if n % r == 0:
            return r
    return 1


def _plan_stream(n, max_tile_cols=MAX_TILE_COLS):
    """Static tiling plan for a flat stream of `n` elements.

    The stream is viewed (free bitcast, no copy, no pad) as (rows, cols) with
    rows in {8,4,2,1}; the column axis is tiled with `tile_cols` columns
    (a multiple of 128, or the full column count for small streams).
    """
    rows = _row_factor(n)
    cols = n // rows
    if cols <= max_tile_cols:
        tile_cols = cols
        n_tiles = 1
    else:
        tile_cols = max_tile_cols
        n_tiles = pl.cdiv(cols, tile_cols)
    return dict(rows=rows, cols=cols, tile_cols=tile_cols, n_tiles=n_tiles)


def _num_shards():
    """2 on multi-TensorCore chips (v4/v5p megacore, v7x); 1 on v5e/v6e."""
    try:
        kind = jax.devices()[0].device_kind.lower()
    except Exception:
        return 1
    return 2 if any(t in kind for t in ("v4", "v5p", "v7", "7x")) else 1


def _index_map(n_tiles, steps_per_shard):
    if n_tiles == 1:
        return lambda s, k: (0, 0)
    last = n_tiles - 1
    # Clamp: once this stream is exhausted the block index stops changing,
    # so Pallas issues no further DMAs for it.
    return lambda s, k: (0, jnp.minimum(s * steps_per_shard + k, last))


def _make_kernel(plans, take_logs, subtracts, steps_per_shard):
    def kernel(lam_ref, int_ref, out_ref, acc_ref):
        s = pl.program_id(0)
        k = pl.program_id(1)
        g = s * steps_per_shard + k  # global tile index for this step

        @pl.when(k == 0)
        def _init():
            acc_ref[...] = jnp.zeros_like(acc_ref)

        def contribute(ref, plan, take_log, subtract):
            rows = plan["rows"]
            cols = plan["cols"]
            tile_cols = plan["tile_cols"]
            n_tiles = plan["n_tiles"]

            def add(masked):
                v = ref[...].astype(jnp.float32)
                if take_log:
                    v = jnp.log(v + _EPS)
                if masked:
                    # Only the single ragged boundary tile pays for this mask
                    # (undefined data past the end of the stream must not leak
                    # into either the log-sum or the plain sum).
                    lane = lax.broadcasted_iota(jnp.int32, (rows, tile_cols), 1)
                    v = jnp.where(lane < (cols - g * tile_cols), v, 0.0)
                # Full-tile reduce (~1 VPU add per data vreg + one XLU tail op)
                # broadcast-added into a full-vreg accumulator -> no masked
                # sub-(8,128) stores on any step.
                p = jnp.sum(v)
                if subtract:
                    acc_ref[...] = acc_ref[...] - p
                else:
                    acc_ref[...] = acc_ref[...] + p

            ragged = (cols % tile_cols) != 0
            if n_tiles == 1:
                @pl.when(g == 0)
                def _():
                    add(False)
            elif not ragged:
                @pl.when(g < n_tiles)
                def _():
                    add(False)
            else:
                @pl.when(g < n_tiles - 1)
                def _():
                    add(False)

                @pl.when(g == n_tiles - 1)
                def _():
                    add(True)

        contribute(lam_ref, plans[0], take_logs[0], subtracts[0])
        contribute(int_ref, plans[1], take_logs[1], subtracts[1])

        @pl.when(k == pl.num_programs(1) - 1)
        def _finalize():
            # Per-shard partial, replicated across the (8, 128) output block.
            out_ref[...] = acc_ref[...]

    return kernel


def max_log_like(lambda_t, Lambda_t, c=None, *, _max_tile_cols=MAX_TILE_COLS):
    """Negative log-likelihood of a batch of point-process events.

    nll = -sum(log(lambda_t + eps)) + sum(Lambda_t)

    `c` (event types) is accepted for API parity with the PyTorch module; the
    reference forward ignores it (lambda_t is already the per-event intensity).
    TODO(synk): if lambda_t were per-type, gathering the observed-type
    intensity with `c` would need an extra gather stage (not in the reference).
    """
    lam = jnp.asarray(lambda_t)
    Lam = jnp.asarray(Lambda_t)
    n_lam = int(np.prod(lam.shape)) if lam.ndim else 1
    n_int = int(np.prod(Lam.shape)) if Lam.ndim else 1
    if n_lam == 0 or n_int == 0:  # degenerate sizes: keep the kernel simple
        return (-jnp.sum(jnp.log(lam.astype(jnp.float32) + _EPS))
                + jnp.sum(Lam.astype(jnp.float32)))

    plans = (_plan_stream(n_lam, _max_tile_cols),
             _plan_stream(n_int, _max_tile_cols))
    # Free (contiguous, row-major) reshapes: no pad, no copy, HBM dtype kept.
    lam_v = lam.reshape(plans[0]["rows"], plans[0]["cols"])
    Lam_v = Lam.reshape(plans[1]["rows"], plans[1]["cols"])

    total_tiles = max(plans[0]["n_tiles"], plans[1]["n_tiles"])
    shards = max(1, min(_num_shards(), total_tiles))
    steps = pl.cdiv(total_tiles, shards)

    kernel = _make_kernel(plans, take_logs=(True, False),
                          subtracts=(True, False), steps_per_shard=steps)

    out = pl.pallas_call(
        kernel,
        out_shape=jax.ShapeDtypeStruct((SUBLANES, shards * LANES), jnp.float32),
        grid_spec=pltpu.PrefetchScalarGridSpec(
            num_scalar_prefetch=0,
            grid=(shards, steps),
            in_specs=[
                pl.BlockSpec((plans[0]["rows"], plans[0]["tile_cols"]),
                             _index_map(plans[0]["n_tiles"], steps)),
                pl.BlockSpec((plans[1]["rows"], plans[1]["tile_cols"]),
                             _index_map(plans[1]["n_tiles"], steps)),
            ],
            out_specs=pl.BlockSpec((SUBLANES, LANES), lambda s, k: (0, s)),
            scratch_shapes=[pltpu.VMEM((SUBLANES, LANES), jnp.float32)],
        ),
        compiler_params=pltpu.CompilerParams(
            dimension_semantics=("parallel", "arbitrary"),
            vmem_limit_bytes=_VMEM_LIMIT,
        ),
    )(lam_v, Lam_v)

    # One partial per shard, replicated across its output block.
    partials = out[0].reshape(shards, LANES)[:, 0]
    return jnp.sum(partials)


if __name__ == "__main__":
    key = jax.random.PRNGKey(0)
    k1, k2, k3, k4, k5 = jax.random.split(key, 5)

    # --- Small test, shapes consistent with the module -----------------------
    batch, num_type = 8, 4
    lambda_t = jax.nn.softplus(
        jax.random.normal(k1, (batch, 1), dtype=jnp.float32))
    Lambda_t = jax.nn.softplus(
        jax.random.normal(k2, (batch, num_type), dtype=jnp.float32))
    c = jax.random.randint(k3, (batch, 1), 0, num_type, dtype=jnp.int32)  # unused

    nll = max_log_like(lambda_t, Lambda_t, c)
    jax.block_until_ready(nll)
    ref = -jnp.sum(jnp.log(lambda_t + _EPS)) + jnp.sum(Lambda_t)
    assert jnp.allclose(nll, ref, rtol=1e-5, atol=1e-5), (nll, ref)

    # --- Multi-tile / ragged-boundary path (tiny tiles via test hook) --------
    b2, t2 = 257, 3
    lam2 = jax.nn.softplus(jax.random.normal(k4, (b2, 1), dtype=jnp.float32))
    Lam2 = jax.nn.softplus(jax.random.normal(k5, (b2, t2), dtype=jnp.float32))
    nll2 = max_log_like(lam2, Lam2, _max_tile_cols=LANES)
    jax.block_until_ready(nll2)
    ref2 = -jnp.sum(jnp.log(lam2 + _EPS)) + jnp.sum(Lam2)
    assert jnp.allclose(nll2, ref2, rtol=1e-4, atol=1e-4), (nll2, ref2)

    print("KERNEL_OK")
</pallas_src>

<mosaic_0001>
module attributes {stable_mosaic.version = 11 : i64} {
  func.func @kernel(%arg0: i32, %arg1: i32, %arg2: memref<8x1xf32, #tpu.memory_space<vmem>>, %arg3: memref<8x4xf32, #tpu.memory_space<vmem>>, %arg4: memref<8x128xf32, #tpu.memory_space<vmem>>, %arg5: memref<8x128xf32, #tpu.memory_space<vmem>>) attributes {dimension_semantics = [#tpu.dimension_semantics<parallel>, #tpu.dimension_semantics<arbitrary>], iteration_bounds = array<i64: 1, 1>, scalar_prefetch = 0 : i64, scratch_operands = 1 : i64, tpu.core_type = #tpu.core_type<tc>, window_params = [{pipeline_mode = #tpu.pipeline_mode<synchronous>, transform_indices = @transform_0, window_bounds = array<i64: 8, 1>}, {pipeline_mode = #tpu.pipeline_mode<synchronous>, transform_indices = @transform_1, window_bounds = array<i64: 8, 4>}, {transform_indices = @transform_2, window_bounds = array<i64: 8, 128>}]} {
    %c1_i32 = arith.constant 1 : i32
    %0 = arith.muli %arg0, %c1_i32 : i32
    %1 = arith.addi %0, %arg1 : i32
    %c0_i32 = arith.constant 0 : i32
    %2 = arith.cmpi eq, %arg1, %c0_i32 : i32
    %3 = arith.extui %2 : i1 to i32
    %c0_i32_0 = arith.constant 0 : i32
    %4 = arith.cmpi ne, %3, %c0_i32_0 : i32
    scf.if %4 {
      %cst = arith.constant 0.000000e+00 : f32
      %14 = vector.broadcast %cst : f32 to vector<8x128xf32>
      %c0 = arith.constant 0 : index
      %c0_7 = arith.constant 0 : index
      %15 = vector.load %arg5[%c0, %c0_7] : memref<8x128xf32, #tpu.memory_space<vmem>>, vector<8x128xf32>
      tpu.vector_store %arg5[%c0, %c0_7], %14 {strides = array<i32>} : memref<8x128xf32, #tpu.memory_space<vmem>>, vector<8x128xf32>,
    } else {
    }
    %c0_i32_1 = arith.constant 0 : i32
    %5 = arith.cmpi eq, %1, %c0_i32_1 : i32
    %6 = arith.extui %5 : i1 to i32
    %c0_i32_2 = arith.constant 0 : i32
    %7 = arith.cmpi ne, %6, %c0_i32_2 : i32
    scf.if %7 {
      %c0 = arith.constant 0 : index
      %c0_7 = arith.constant 0 : index
      %14 = vector.load %arg2[%c0, %c0_7] : memref<8x1xf32, #tpu.memory_space<vmem>>, vector<8x1xf32>
      %cst = arith.constant 1.1920929E-7 : f32
      %15 = vector.broadcast %cst : f32 to vector<8x1xf32>
      %16 = arith.addf %14, %15 : vector<8x1xf32>
      %17 = math.log %16 : vector<8x1xf32>
      %18 = vector.shape_cast %17 : vector<8x1xf32> to vector<1x8x1xf32>
      %cst_8 = arith.constant dense<0.000000e+00> : vector<1xf32>
      %19 = vector.multi_reduction <add>, %18, %cst_8 [1, 2] : vector<1x8x1xf32> to vector<1xf32>
      %20 = vector.shape_cast %19 : vector<1xf32> to vector<1x1x1xf32>
      %21 = vector.extract %20[0, 0, 0] : f32 from vector<1x1x1xf32>
      %c0_9 = arith.constant 0 : index
      %c0_10 = arith.constant 0 : index
      %22 = vector.load %arg5[%c0_9, %c0_10] : memref<8x128xf32, #tpu.memory_space<vmem>>, vector<8x128xf32>
      %23 = vector.broadcast %21 : f32 to vector<8x128xf32>
      %24 = arith.subf %22, %23 : vector<8x128xf32>
      %c0_11 = arith.constant 0 : index
      %c0_12 = arith.constant 0 : index
      %25 = vector.load %arg5[%c0_11, %c0_12] : memref<8x128xf32, #tpu.memory_space<vmem>>, vector<8x128xf32>
      tpu.vector_store %arg5[%c0_11, %c0_12], %24 {strides = array<i32>} : memref<8x128xf32, #tpu.memory_space<vmem>>, vector<8x128xf32>,
    } else {
    }
    %c0_i32_3 = arith.constant 0 : i32
    %8 = arith.cmpi eq, %1, %c0_i32_3 : i32
    %9 = arith.extui %8 : i1 to i32
    %c0_i32_4 = arith.constant 0 : i32
    %10 = arith.cmpi ne, %9, %c0_i32_4 : i32
    scf.if %10 {
      %c0 = arith.constant 0 : index
      %c0_7 = arith.constant 0 : index
      %14 = vector.load %arg3[%c0, %c0_7] : memref<8x4xf32, #tpu.memory_space<vmem>>, vector<8x4xf32>
      %15 = vector.shape_cast %14 : vector<8x4xf32> to vector<1x8x4xf32>
      %cst = arith.constant dense<0.000000e+00> : vector<1xf32>
      %16 = vector.multi_reduction <add>, %15, %cst [1, 2] : vector<1x8x4xf32> to vector<1xf32>
      %17 = vector.shape_cast %16 : vector<1xf32> to vector<1x1x1xf32>
      %18 = vector.extract %17[0, 0, 0] : f32 from vector<1x1x1xf32>
      %c0_8 = arith.constant 0 : index
      %c0_9 = arith.constant 0 : index
      %19 = vector.load %arg5[%c0_8, %c0_9] : memref<8x128xf32, #tpu.memory_space<vmem>>, vector<8x128xf32>
      %20 = vector.broadcast %18 : f32 to vector<8x128xf32>
      %21 = arith.addf %19, %20 : vector<8x128xf32>
      %c0_10 = arith.constant 0 : index
      %c0_11 = arith.constant 0 : index
      %22 = vector.load %arg5[%c0_10, %c0_11] : memref<8x128xf32, #tpu.memory_space<vmem>>, vector<8x128xf32>
      tpu.vector_store %arg5[%c0_10, %c0_11], %21 {strides = array<i32>} : memref<8x128xf32, #tpu.memory_space<vmem>>, vector<8x128xf32>,
    } else {
    }
    %c0_i32_5 = arith.constant 0 : i32
    %11 = arith.cmpi eq, %arg1, %c0_i32_5 : i32
    %12 = arith.extui %11 : i1 to i32
    %c0_i32_6 = arith.constant 0 : i32
    %13 = arith.cmpi ne, %12, %c0_i32_6 : i32
    scf.if %13 {
      %c0 = arith.constant 0 : index
      %c0_7 = arith.constant 0 : index
      %14 = vector.load %arg5[%c0, %c0_7] : memref<8x128xf32, #tpu.memory_space<vmem>>, vector<8x128xf32>
      %c0_8 = arith.constant 0 : index
      %c0_9 = arith.constant 0 : index
      %15 = vector.load %arg4[%c0_8, %c0_9] : memref<8x128xf32, #tpu.memory_space<vmem>>, vector<8x128xf32>
      tpu.vector_store %arg4[%c0_8, %c0_9], %14 {strides = array<i32>} : memref<8x128xf32, #tpu.memory_space<vmem>>, vector<8x128xf32>,
    } else {
    }
    return
  }
  func.func @transform_0(%arg0: i32, %arg1: i32) -> (i32, i32) {
    %c0_i32 = arith.constant 0 : i32
    %c0_i32_0 = arith.constant 0 : i32
    %c0_i32_1 = arith.constant 0 : i32
    return %c0_i32, %c0_i32_0 : i32, i32
  }
  func.func @transform_1(%arg0: i32, %arg1: i32) -> (i32, i32) {
    %c0_i32 = arith.constant 0 : i32
    %c0_i32_0 = arith.constant 0 : i32
    %c0_i32_1 = arith.constant 0 : i32
    return %c0_i32, %c0_i32_0 : i32, i32
  }
  func.func @transform_2(%arg0: i32, %arg1: i32) -> (i32, i32) {
    %c0_i32 = arith.constant 0 : i32
    %c0_i32_0 = arith.constant 0 : i32
    return %c0_i32, %arg0 : i32, i32
  }
}

</mosaic_0001>

<bundles_post_ra>
// kernel: tpu_custom_call.1
= control target key start
LH: loop header
LB: loop body
LE: loop exit
PB: predicated region body
PF: predicated region fallthrough
CT: control target
= control target key end

     0   :  { %s136_s0 = inlined_call_operand.vmem [shape: f32[8,1], index: 0, kind: input, shape index: {}]   ;;  %s137_s1 = inlined_call_operand.vmem [shape: f32[8,4], index: 1, kind: input, shape index: {}]   ;;  %s138_s2 = inlined_call_operand.hbm [shape: f32[8,128], index: 2, kind: output, shape index: {}]  }
   0x1   :  { %v22_v0 = vld [vmem:[%s136_s0] sm:$0xff] }
   0x2   :  { %7 = vsyncpa [#allocation4], 0  ;;  %v23_v1 = vadd.f32 1.1920929e-07, %v22_v0  ;;  %vm26_vm0 = vcmask 7168   ;;  %v41_v5 = vld [vmem:[%s137_s1] sm:$0xff]  ;;  %vm42_vm1 = vcmask 31744  }
   0x3   :  { %v43_v6 = vsel %vm42_vm1, %v41_v5, 0.0  ;;  %s111_s1 = smov [#allocation3]   ;;  %s69_s16 = sshll.u32 %s138_s2, 4  ;;  %s70_s16 = int_to_ptr.hbm [resolvable:$true] %s69_s16 }
   0x4   :  { %83 = vlog2.f32 %v23_v1  ;;  %s67_s13 = sshll.u32 %s111_s1, 4  ;;  %s68_s13 = int_to_ptr.vmem [resolvable:$true] %s67_s13 }
   0xa   :  { %v84_v2 = vpop.eup %83 }
   0xb   :  { %v25_v3 = vmul.f32 0.6931472, %v84_v2 }
   0xd   :  { %v27_v4 = vsel %vm26_vm0, %v25_v3, 0.0 }
   0xe   :  { %28 = vadd.xlane.f32.xlu0 %v27_v4 }
  0x16   :  { %44 = vadd.xlane.f32.xlu0 %v43_v6 }
  0x81   :  { %v29_v7 = vpop.xlane.xlu0 %28 }
  0x82   :  { %v30_v8 = vrot.slane %v29_v7, 4 }
  0x84   :  { %v31_v9 = vadd.f32 %v30_v8, %v29_v7 }
  0x86   :  { %v32_v10 = vrot.slane %v31_v9, 2 }
  0x88   :  { %v33_v11 = vadd.f32 %v32_v10, %v31_v9 }
  0x89   :  { %v45_v12 = vpop.xlane.xlu0 %44 }
  0x8a   :  { %v46_v13 = vrot.slane %v45_v12, 4  ;;  %v34_v14 = vrot.slane %v33_v11, 1 }
  0x8c   :  { %v47_v15 = vadd.f32 %v46_v13, %v45_v12  ;;  %v35_v16 = vadd.f32 %v34_v14, %v33_v11 }
  0x8e   :  { %v48_v17 = vrot.slane %v47_v15, 2  ;;  %78 = vpush %v35_v16 }
  0x90   :  { %v49_v18 = vadd.f32 %v48_v17, %v47_v15 }
  0x92   :  { %v50_v19 = vrot.slane %v49_v18, 1 }
  0x94   :  { %v51_v20 = vadd.f32 %v50_v19, %v49_v18 }
  0x96   :  { %80 = vpush %v51_v20 }
  0xbf   :  { %s79_s0 = spop %78 }
  0xc0   :  { %v38_v21 = vstv %s79_s0 }
  0xc1   :  { %v39_v22 = vsub.f32 0.0, %v38_v21 }
  0xc7   :  { %s81_s17 = spop %80 }
  0xc8   :  { %v54_v23 = vstv %s81_s17 }
  0xc9   :  { %v55_v24 = vadd.f32 %v54_v23, %v39_v22 }
  0xcb   :  { %61 = vst [vmem:[#allocation3] sm:$0xff] %v55_v24 }
  0xcc   :  { %72 = dma.vmem_to_hbm [thread:$0]  %s68_s13, 128, %s70_s16, [#allocation4]  }
  0xcd   :  { %109 = dma.done.wait [#allocation4], 128  }
  0xce   :  { %110 = vsyncadd [#allocation4], 4294967168 }
  0xcf   :  { %77 = vsyncpa [#allocation4], 1 }

</bundles_post_ra>
